<compile_context>
chip_gen: v6e
topology: v6e:2x2x1
jax: 0.10.0
libtpu: 0.0.40
codegen_flags: <defaults>
</compile_context>

<pallas_src>
import functools

import jax
import jax.numpy as jnp
from jax import lax
from jax.experimental import pallas as pl
from jax.experimental.pallas import tpu as pltpu


def _round_up(x, m):
    return (x + m - 1) // m * m


def _embeddings_kernel(uid_ref, iid_ref,   # (TB, 1) int32 blocked id inputs
                       tab_ref,            # (V_pad, W_pad) VMEM-resident table
                       out_ref,            # (TB, W_pad) fused output block
                       *, num_users):
    tb = out_ref.shape[0]
    v_pad = tab_ref.shape[0]

    uid = uid_ref[...]                       # (TB, 1)
    iid = iid_ref[...] + num_users           # item rows live below user rows

    cols = lax.broadcasted_iota(jnp.int32, (tb, v_pad), 1)
    onehot = jnp.logical_or(cols == uid, cols == iid).astype(tab_ref.dtype)

    # One MXU matmul produces the whole block already in final lane layout
    # [mf_u | mf_i | mlp_u | mlp_i | pad]; exact (1.0 * x, disjoint regions).
    out_ref[...] = jnp.dot(
        onehot, tab_ref[...], preferred_element_type=jnp.float32
    ).astype(out_ref.dtype)


def general_embeddings_forward(user_ids, item_ids,
                               mf_user_w, mf_item_w,
                               mlp_user_w, mlp_item_w):
    """Returns (mf_user_latent, mf_item_latent, mlp_vector)."""
    B = user_ids.shape[0]
    mf_dim = mf_user_w.shape[1]
    half = mlp_user_w.shape[1]               # embedding_dim = mlp_layer // 2
    assert mf_dim > 0 and half > 0
    V_u, V_i = mf_user_w.shape[0], mf_item_w.shape[0]
    V = V_u + V_i
    V_pad = _round_up(V, 128)                # lane dim of the one-hot matrix
    W = 2 * mf_dim + 2 * half                # fused output width
    W_pad = _round_up(W, 128)                # lane-dense output block

    out_dtype = jnp.result_type(mf_user_w.dtype, mf_item_w.dtype,
                                mlp_user_w.dtype, mlp_item_w.dtype)

    # One-time stacked table: each row already in its FINAL lane positions.
    #   user row r : [ mf_user[r] | 0 | mlp_user[r] | 0 | pad ]
    #   item row r : [ 0 | mf_item[r] | 0 | mlp_item[r] | pad ]
    zu_mf = jnp.zeros((V_u, mf_dim), out_dtype)
    zu_hf = jnp.zeros((V_u, half), out_dtype)
    zi_mf = jnp.zeros((V_i, mf_dim), out_dtype)
    zi_hf = jnp.zeros((V_i, half), out_dtype)
    user_rows = jnp.concatenate(
        [mf_user_w.astype(out_dtype), zu_mf, mlp_user_w.astype(out_dtype), zu_hf], axis=1)
    item_rows = jnp.concatenate(
        [zi_mf, mf_item_w.astype(out_dtype), zi_hf, mlp_item_w.astype(out_dtype)], axis=1)
    tab = jnp.concatenate([user_rows, item_rows], axis=0)
    tab = jnp.pad(tab, ((0, V_pad - V), (0, W_pad - W)))

    # Batch blocking: big blocks for big batches, pad B to a block multiple.
    TB = 512 if B >= 512 else _round_up(B, 8)
    B_pad = _round_up(B, TB)
    pad = B_pad - B
    uid = jnp.pad(user_ids.astype(jnp.int32), (0, pad)).reshape(B_pad, 1)
    iid = jnp.pad(item_ids.astype(jnp.int32), (0, pad)).reshape(B_pad, 1)

    # VMEM budget from actual footprint (headroom included), capped for v7x.
    itemsize = jnp.dtype(out_dtype).itemsize
    table_bytes = 2 * V_pad * W_pad * itemsize          # double-buffered table
    out_bytes = 2 * TB * W_pad * itemsize               # double-buffered output
    id_bytes = 2 * 2 * TB * 4
    work_bytes = 4 * TB * V_pad * 4                     # one-hot / iota temporaries
    vmem_limit = int(min(48 * 1024 * 1024,
                         max(16 * 1024 * 1024,
                             table_bytes + out_bytes + id_bytes + work_bytes
                             + (4 << 20))))

    grid_spec = pltpu.PrefetchScalarGridSpec(
        num_scalar_prefetch=0,
        grid=(B_pad // TB,),
        in_specs=[
            pl.BlockSpec((TB, 1), lambda b: (b, 0)),          # user ids block
            pl.BlockSpec((TB, 1), lambda b: (b, 0)),          # item ids block
            pl.BlockSpec((V_pad, W_pad), lambda b: (0, 0)),   # resident table
        ],
        out_specs=pl.BlockSpec((TB, W_pad), lambda b: (b, 0)),
    )

    fused = pl.pallas_call(
        functools.partial(_embeddings_kernel, num_users=V_u),
        out_shape=jax.ShapeDtypeStruct((B_pad, W_pad), out_dtype),
        grid_spec=grid_spec,
        compiler_params=pltpu.CompilerParams(
            dimension_semantics=("parallel",),   # batch blocks independent
            vmem_limit_bytes=vmem_limit),
    )(uid, iid, tab)

    fused = fused[:B]
    mf_user_latent = fused[:, :mf_dim]
    mf_item_latent = fused[:, mf_dim:2 * mf_dim]
    mlp_vector = fused[:, 2 * mf_dim:2 * mf_dim + 2 * half]   # [mlp_u | mlp_i]
    return mf_user_latent, mf_item_latent, mlp_vector


if __name__ == "__main__":
    # Small shapes consistent with the module's forward.
    num_users, num_items = 10, 12
    mf_dim = 32
    mlp_layer = 64
    embedding_dim = mlp_layer // 2
    B = 8

    key = jax.random.PRNGKey(0)
    k1, k2, k3, k4, k5, k6 = jax.random.split(key, 6)

    # _init_weight_: MF tables ~ N(0, 0.01); MLP tables keep nn.Embedding
    # default init N(0, 1).
    mf_user_w = 0.01 * jax.random.normal(k1, (num_users, mf_dim), jnp.float32)
    mf_item_w = 0.01 * jax.random.normal(k2, (num_items, mf_dim), jnp.float32)
    mlp_user_w = jax.random.normal(k3, (num_users, embedding_dim), jnp.float32)
    mlp_item_w = jax.random.normal(k4, (num_items, embedding_dim), jnp.float32)

    user_ids = jax.random.randint(k5, (B,), 0, num_users, dtype=jnp.int32)
    item_ids = jax.random.randint(k6, (B,), 0, num_items, dtype=jnp.int32)

    mf_u, mf_i, mlp_vec = general_embeddings_forward(
        user_ids, item_ids, mf_user_w, mf_item_w, mlp_user_w, mlp_item_w)
    jax.block_until_ready((mf_u, mf_i, mlp_vec))

    # Pure-JAX reference check.
    ref_mf_u = mf_user_w[user_ids]
    ref_mf_i = mf_item_w[item_ids]
    ref_mlp = jnp.concatenate([mlp_user_w[user_ids], mlp_item_w[item_ids]],
                              axis=-1)

    assert mf_u.shape == (B, mf_dim) and mf_i.shape == (B, mf_dim)
    assert mlp_vec.shape == (B, mlp_layer)
    assert jnp.allclose(mf_u, ref_mf_u)
    assert jnp.allclose(mf_i, ref_mf_i)
    assert jnp.allclose(mlp_vec, ref_mlp)

    print("KERNEL_OK")
</pallas_src>

<mosaic_0001>
module attributes {stable_mosaic.version = 11 : i64} {
  func.func @_embeddings_kernel(%arg0: i32, %arg1: memref<8x1xi32, #tpu.memory_space<vmem>>, %arg2: memref<8x1xi32, #tpu.memory_space<vmem>>, %arg3: memref<128x128xf32, #tpu.memory_space<vmem>>, %arg4: memref<8x128xf32, #tpu.memory_space<vmem>>) attributes {dimension_semantics = [#tpu.dimension_semantics<parallel>], iteration_bounds = array<i64: 1>, scalar_prefetch = 0 : i64, scratch_operands = 0 : i64, tpu.core_type = #tpu.core_type<tc>, window_params = [{transform_indices = @transform_0, window_bounds = array<i64: 8, 1>}, {transform_indices = @transform_1, window_bounds = array<i64: 8, 1>}, {pipeline_mode = #tpu.pipeline_mode<synchronous>, transform_indices = @transform_2, window_bounds = array<i64: 128, 128>}, {transform_indices = @transform_3, window_bounds = array<i64: 8, 128>}]} {
    %c0 = arith.constant 0 : index
    %c0_0 = arith.constant 0 : index
    %0 = vector.load %arg1[%c0, %c0_0] : memref<8x1xi32, #tpu.memory_space<vmem>>, vector<8x1xi32>
    %c0_1 = arith.constant 0 : index
    %c0_2 = arith.constant 0 : index
    %1 = vector.load %arg2[%c0_1, %c0_2] : memref<8x1xi32, #tpu.memory_space<vmem>>, vector<8x1xi32>
    %c10_i32 = arith.constant 10 : i32
    %2 = vector.broadcast %c10_i32 : i32 to vector<8x1xi32>
    %3 = arith.addi %1, %2 : vector<8x1xi32>
    %4 = tpu.iota {dimensions = array<i32: 1>} : vector<8x128xi32>
    %5 = vector.broadcast %0 : vector<8x1xi32> to vector<8x128xi32>
    %6 = arith.cmpi eq, %4, %5 : vector<8x128xi32>
    %7 = vector.broadcast %3 : vector<8x1xi32> to vector<8x128xi32>
    %8 = arith.cmpi eq, %4, %7 : vector<8x128xi32>
    %9 = arith.ori %6, %8 : vector<8x128xi1>
    %10 = arith.extui %9 : vector<8x128xi1> to vector<8x128xi32>
    %11 = arith.sitofp %10 : vector<8x128xi32> to vector<8x128xf32>
    %c0_3 = arith.constant 0 : index
    %c0_4 = arith.constant 0 : index
    %12 = vector.load %arg3[%c0_3, %c0_4] : memref<128x128xf32, #tpu.memory_space<vmem>>, vector<128x128xf32>
    %cst = arith.constant dense<0.000000e+00> : vector<8x128xf32>
    %13 = tpu.matmul %11, %12, %cst {dimension_numbers = #tpu.dot_dimension_numbers<[1], [0], [0], [1], [0, 0, 1, 1], [], []>} : vector<8x128xf32>, vector<128x128xf32>, vector<8x128xf32> -> vector<8x128xf32>
    %c0_5 = arith.constant 0 : index
    %c0_6 = arith.constant 0 : index
    %14 = vector.load %arg4[%c0_5, %c0_6] : memref<8x128xf32, #tpu.memory_space<vmem>>, vector<8x128xf32>
    tpu.vector_store %arg4[%c0_5, %c0_6], %13 {strides = array<i32>} : memref<8x128xf32, #tpu.memory_space<vmem>>, vector<8x128xf32>,
    return
  }
  func.func @transform_0(%arg0: i32) -> (i32, i32) {
    %c0_i32 = arith.constant 0 : i32
    %c0_i32_0 = arith.constant 0 : i32
    return %arg0, %c0_i32 : i32, i32
  }
  func.func @transform_1(%arg0: i32) -> (i32, i32) {
    %c0_i32 = arith.constant 0 : i32
    %c0_i32_0 = arith.constant 0 : i32
    return %arg0, %c0_i32 : i32, i32
  }
  func.func @transform_2(%arg0: i32) -> (i32, i32) {
    %c0_i32 = arith.constant 0 : i32
    %c0_i32_0 = arith.constant 0 : i32
    %c0_i32_1 = arith.constant 0 : i32
    return %c0_i32, %c0_i32_0 : i32, i32
  }
  func.func @transform_3(%arg0: i32) -> (i32, i32) {
    %c0_i32 = arith.constant 0 : i32
    %c0_i32_0 = arith.constant 0 : i32
    return %arg0, %c0_i32 : i32, i32
  }
}

</mosaic_0001>

<bundles_post_ra>
// kernel: tpu_custom_call.1
= control target key start
LH: loop header
LB: loop body
LE: loop exit
PB: predicated region body
PF: predicated region fallthrough
CT: control target
= control target key end

     0   :  { %8 = vsyncpa [#allocation3], 0  ;;  %s294_s0 = inlined_call_operand.vmem [shape: s32[8,1], index: 0, kind: input, shape index: {}]   ;;  %s295_s1 = inlined_call_operand.vmem [shape: s32[8,1], index: 1, kind: input, shape index: {}]   ;;  %s296_s2 = inlined_call_operand.hbm [shape: f32[128,128], index: 2, kind: input, shape index: {}]   ;;  %s297_s3 = inlined_call_operand.hbm [shape: f32[8,128], index: 3, kind: output, shape index: {}]  }
   0x1   :  { %9 = vsyncpa [#allocation4], 0  ;;  %s254_s12 = smov [#allocation2]  }
   0x2   :  { %s19_s13 = sshll.u32 %s254_s12, 4  ;;  %s20_s13 = int_to_ptr.vmem [resolvable:$true] %s19_s13 }
   0x3   :  { %s218_s14 = scalar_lea.vmem %s20_s13, 2048  ;;  %p223_p1 = scmp.lt.s32.totalorder %s20_s13, %s20_s13 }
   0x4   :  { %p219_p0 = scmp.ne.s32.totalorder %s20_s13, %s218_s14  ;;  %p224_p2 = scmp.lt.s32.totalorder %s218_s14, %s218_s14 }
   0x6   :  { %p225_p3 = por %p224_p2, %p223_p1 }
   0x8   :  { %p226_p4 = pnand %p225_p3, %p219_p0 }
   0xa   :  { %229 = shalt.err (!%p226_p4)
}
   0xb   :  { %s255_s15 = smov 128   ;;  %s256_s16 = smov 8  }
   0xc   :  { %25 = dma.hbm_to_vmem [thread:$0]  %s296_s2, 2048, %s20_s13, [#allocation3], %s255_s15, %s255_s15, %s256_s16  }
   0xd   :  { %250 = dma.done.wait [#allocation3], 2048  }
   0xe   :  { %251 = vsyncadd [#allocation3], 4294965248  ;;  %v257_v0 = vmov 0   ;;  %v258_v1 = vmov 0.0   ;;  %v29_v2 = vld [vmem:[%s294_s0] sm:$0xff]  ;;  %v60_v4 = vld [vmem:[#allocation2 + $0x78] sm:$0xff]  ;;  %v32_v21 = vlaneseq }
   0xf   :  { %209 = vset.pattern.permute.xlu0 %v257_v0  ;;  %166 = vmatprep.subr.mxu0 %v258_v1  ;;  %v30_v3 = vld [vmem:[%s295_s1] sm:$0xff]  ;;  %v59_v6 = vld [vmem:[#allocation2 + $0x70] sm:$0xff]  ;;  %v58_v7 = vld [vmem:[#allocation2 + $0x68] sm:$0xff]  ;;  %vm259_vm0 = vmmov 0   ;;  %v260_v25 = vmov 1.0   ;;  %s261_s0 = smov [#allocation5]  }
  0x10   :  { %35 = vperm.xlu0 %209, %v29_v2   ;;  %v31_v5 = vadd.s32 10, %v30_v3  ;;  %167 = vmatpush3.msra.mxu0 %v60_v4  ;;  %v57_v8 = vld [vmem:[#allocation2 + $0x60] sm:$0xff]  ;;  %v56_v9 = vld [vmem:[#allocation2 + $0x58] sm:$0xff]  ;;  %v55_v10 = vld [vmem:[#allocation2 + $0x50] sm:$0xff]  ;;  %v33_v23 = vand.u32 127, %v32_v21  ;;  %s138_s1 = sshll.u32 %s261_s0, 4  ;;  %s139_s1 = int_to_ptr.vmem [resolvable:$true] %s138_s1 }
  0x11   :  { %168 = vmatprep.subr.mxu0 %v258_v1  ;;  %198 = vmatprep.mubr.msk.f32.mxu0 %vm259_vm0, %v258_v1  ;;  %v54_v11 = vld [vmem:[#allocation2 + $0x48] sm:$0xff]  ;;  %v53_v12 = vld [vmem:[#allocation2 + $0x40] sm:$0xff]  ;;  %v52_v13 = vld [vmem:[#allocation2 + $0x38] sm:$0xff]  ;;  %s230_s2 = scalar_lea.vmem %s139_s1, 128  ;;  %p235_p6 = scmp.lt.s32.totalorder %s139_s1, %s139_s1 }
  0x12   :  { %169 = vmatpush3.msra.mxu0 %v59_v6  ;;  %v51_v14 = vld [vmem:[#allocation2 + $0x30] sm:$0xff]  ;;  %v50_v15 = vld [vmem:[#allocation2 + $0x28] sm:$0xff]  ;;  %v49_v16 = vld [vmem:[#allocation2 + $0x20] sm:$0xff]  ;;  %p231_p5 = scmp.ne.s32.totalorder %s139_s1, %s230_s2  ;;  %p236_p7 = scmp.lt.s32.totalorder %s230_s2, %s230_s2 }
  0x13   :  { %170 = vmatprep.subr.mxu0 %v258_v1  ;;  %v48_v17 = vld [vmem:[#allocation2 + $0x18] sm:$0xff]  ;;  %v47_v18 = vld [vmem:[#allocation2 + $0x10] sm:$0xff]  ;;  %v46_v19 = vld [vmem:[#allocation2 + $0x8] sm:$0xff] }
  0x14   :  { %39 = vperm.xlu0 %209, %v31_v5   ;;  %171 = vmatpush3.msra.mxu0 %v58_v7  ;;  %v45_v20 = vld [vmem:[#allocation2] sm:$0xff]  ;;  %p237_p8 = por %p236_p7, %p235_p6 }
  0x15   :  { %172 = vmatprep.subr.mxu0 %v258_v1 }
  0x16   :  { %173 = vmatpush3.msra.mxu0 %v57_v8  ;;  %p238_p9 = pnand %p237_p8, %p231_p5 }
  0x17   :  { %174 = vmatprep.subr.mxu0 %v258_v1 }
  0x18   :  { %175 = vmatpush3.msra.mxu0 %v56_v9 }
  0x19   :  { %176 = vmatprep.subr.mxu0 %v258_v1 }
  0x1a   :  { %177 = vmatpush3.msra.mxu0 %v55_v10 }
  0x1b   :  { %178 = vmatprep.subr.mxu0 %v258_v1 }
  0x1c   :  { %179 = vmatpush3.msra.mxu0 %v54_v11 }
  0x1d   :  { %180 = vmatprep.subr.mxu0 %v258_v1 }
  0x1e   :  { %181 = vmatpush3.msra.mxu0 %v53_v12 }
  0x1f   :  { %182 = vmatprep.subr.mxu0 %v258_v1 }
  0x20   :  { %183 = vmatpush3.msra.mxu0 %v52_v13 }
  0x21   :  { %184 = vmatprep.subr.mxu0 %v258_v1 }
  0x22   :  { %185 = vmatpush3.msra.mxu0 %v51_v14 }
  0x23   :  { %186 = vmatprep.subr.mxu0 %v258_v1 }
  0x24   :  { %187 = vmatpush3.msra.mxu0 %v50_v15 }
  0x25   :  { %188 = vmatprep.subr.mxu0 %v258_v1 }
  0x26   :  { %189 = vmatpush3.msra.mxu0 %v49_v16 }
  0x27   :  { %190 = vmatprep.subr.mxu0 %v258_v1 }
  0x28   :  { %191 = vmatpush3.msra.mxu0 %v48_v17 }
  0x29   :  { %192 = vmatprep.subr.mxu0 %v258_v1 }
  0x2a   :  { %193 = vmatpush3.msra.mxu0 %v47_v18 }
  0x2b   :  { %194 = vmatprep.subr.mxu0 %v258_v1 }
  0x2c   :  { %195 = vmatpush3.msra.mxu0 %v46_v19 }
  0x2d   :  { %196 = vmatprep.subr.mxu0 %v258_v1 }
  0x2e   :  { %197 = vmatpush3.msra.mxu0 %v45_v20 }
  0x8b   :  { %v36_v22 = vpop.permute.xlu0 %35 }
  0x8c   :  { %vm37_vm1 = vcmp.eq.s32.totalorder %v33_v23, %v36_v22 }
  0x8f   :  { %v40_v24 = vpop.permute.xlu0 %39 }
  0x90   :  { %vm41_vm2 = vcmp.eq.s32.totalorder %v33_v23, %v40_v24 }
  0x91   :  { %vm42_vm3 = vmor %vm37_vm1, %vm41_vm2 }
  0x92   :  { %199 = vmatmul.mubr.msk.f32.vlgmr.msra.gmra.mxu0 %vm42_vm3, %v260_v25 }
 0x152   :  { %v127_v26 = vpop.f32.mrf.mxu0 }
 0x153   :  { %131 = vst [vmem:[#allocation5] sm:$0xff] %v127_v26 }
 0x154   :  { %v200_v27 = vpop.f32.mrf.mxu0 }
 0x155   :  { %241 = shalt.err (!%p238_p9)
}
 0x156   :  { %141 = dma.vmem_to_hbm [thread:$0]  %s139_s1, 128, %s297_s3, [#allocation4]  }
 0x157   :  { %252 = dma.done.wait [#allocation4], 128  }
 0x158   :  { %253 = vsyncadd [#allocation4], 4294967168 }
 0x159   :  { %145 = vsyncpa [#allocation3], 1 }
 0x15a   :  { %146 = vsyncpa [#allocation4], 1 }

</bundles_post_ra>
